<compile_context>
chip_gen: v5e
topology: v5e:2x2
jax: 0.10.0
libtpu: 0.0.40
codegen_flags: <defaults>
</compile_context>

<pallas_src>
import numpy as np
import jax
import jax.numpy as jnp
from jax.experimental import pallas as pl
from jax.experimental.pallas import tpu as pltpu


def _round_up(a, b):
    return (a + b - 1) // b * b


def autoencoder_kernel(x_ref, w_enc_ref, b_enc_ref, w_dec_ref, b_dec_ref, o_ref):
    # Encoder: h = relu(x @ W_enc_t + b_enc)   (bf16 matmul, f32 accumulate/epilogue)
    h = jnp.dot(x_ref[...], w_enc_ref[...], preferred_element_type=jnp.float32)
    h = jnp.maximum(h + b_enc_ref[...], 0.0)                      # (tb, Hp) + (1, Hp)
    # Decoder: y = h @ W_dec_t + b_dec          (bf16 matmul, f32 accumulate/epilogue)
    y = jnp.dot(h.astype(jnp.bfloat16), w_dec_ref[...],
                preferred_element_type=jnp.float32)
    o_ref[...] = (y + b_dec_ref[...]).astype(o_ref.dtype)         # (tb, Fp) + (1, Fp)


def prepare_params(w_enc, b_enc, w_dec, b_dec):
    """One-time glue: transpose PyTorch-layout weights, cast to bf16, zero-pad
       F and H up to multiples of 128 (lane-dense), make biases (1, dim) f32 rows.

       w_enc: [H, F], b_enc: [H], w_dec: [F, H], b_dec: [F]  (PyTorch nn.Linear layout)
    """
    H, F = w_enc.shape
    Fp = _round_up(F, 128)
    Hp = _round_up(H, 128)

    w_enc_t = jnp.zeros((Fp, Hp), jnp.bfloat16).at[:F, :H].set(
        jnp.asarray(w_enc, jnp.float32).T.astype(jnp.bfloat16))
    w_dec_t = jnp.zeros((Hp, Fp), jnp.bfloat16).at[:H, :F].set(
        jnp.asarray(w_dec, jnp.float32).T.astype(jnp.bfloat16))
    b_enc_r = jnp.zeros((1, Hp), jnp.float32).at[0, :H].set(
        jnp.asarray(b_enc, jnp.float32))
    b_dec_r = jnp.zeros((1, Fp), jnp.float32).at[0, :F].set(
        jnp.asarray(b_dec, jnp.float32))
    return (w_enc_t, b_enc_r, w_dec_t, b_dec_r), (F, H)


def autoencoder_forward(x, params, dims, *, tb=None, max_tb=512):
    """x: [B, F] (any float dtype).  params from prepare_params.  Returns [B, F] f32."""
    w_enc_t, b_enc_r, w_dec_t, b_dec_r = params
    F, H = dims
    B = x.shape[0]
    Fp, Hp = w_enc_t.shape

    # Tile choice: fewest, fattest steps.  On v7x with large batches, pass
    # tb = B // 2 (rounded to a multiple of 8) to occupy both TensorCores.
    if tb is None:
        tb = min(_round_up(B, 8), max_tb)
    else:
        tb = _round_up(min(tb, B), 8)
    Bp = _round_up(B, tb)

    # Pad/cast input to (Bp, Fp) bf16 (zero rows / zero feature columns are inert).
    # Fast path: skip the pad entirely when the shape is already aligned.
    x_bf16 = jnp.asarray(x, jnp.float32).astype(jnp.bfloat16)
    if Bp == B and Fp == F:
        x_pad = x_bf16
    else:
        x_pad = jnp.zeros((Bp, Fp), jnp.bfloat16).at[:B, :F].set(x_bf16)

    grid = (Bp // tb,)

    # VMEM budget estimate (double-buffered x/out tiles + resident weights), with
    # headroom, clamped so it is safe on v7x (64 MiB physical per TC).
    bytes_xo = 2 * tb * Fp * (2 + 4)                              # x bf16 + out f32
    bytes_w = 2 * (Fp * Hp * 2 + Hp * Fp * 2 + Hp * 4 + Fp * 4)   # weights + biases
    vmem_limit = int(min(64 << 20, max(16 << 20, 2 * (bytes_xo + bytes_w))))

    cost = pl.CostEstimate(
        flops=int(4 * Bp * Fp * Hp),                    # two matmuls, 2*M*N*K each
        transcendentals=0,
        bytes_accessed=int(Bp * Fp * 2 + 2 * Fp * Hp * 2 + Hp * 4 + Fp * 4
                           + Bp * Fp * 4),
    )

    out = pl.pallas_call(
        autoencoder_kernel,
        out_shape=jax.ShapeDtypeStruct((Bp, Fp), jnp.float32),
        grid_spec=pltpu.PrefetchScalarGridSpec(
            num_scalar_prefetch=0,
            grid=grid,
            in_specs=[
                pl.BlockSpec((tb, Fp), lambda i: (i, 0)),   # x tile over batch
                pl.BlockSpec((Fp, Hp), lambda i: (0, 0)),   # encoder weight (resident)
                pl.BlockSpec((1, Hp), lambda i: (0, 0)),    # encoder bias   (resident)
                pl.BlockSpec((Hp, Fp), lambda i: (0, 0)),   # decoder weight (resident)
                pl.BlockSpec((1, Fp), lambda i: (0, 0)),    # decoder bias   (resident)
            ],
            out_specs=pl.BlockSpec((tb, Fp), lambda i: (i, 0)),
        ),
        compiler_params=pltpu.CompilerParams(
            dimension_semantics=("parallel",),
            vmem_limit_bytes=vmem_limit,
        ),
        cost_estimate=cost,
    )(x_pad, w_enc_t, b_enc_r, w_dec_t, b_dec_r)

    if Bp == B and Fp == F:
        return out
    return out[:B, :F]


def init_params(key, input_features, hidden_features):
    """Deterministic init mimicking nn.Linear default (uniform +/- 1/sqrt(fan_in))."""
    k1, k2, k3, k4 = jax.random.split(key, 4)
    lim_e = 1.0 / np.sqrt(input_features)
    lim_d = 1.0 / np.sqrt(hidden_features)
    w_enc = jax.random.uniform(k1, (hidden_features, input_features),
                               jnp.float32, -lim_e, lim_e)
    b_enc = jax.random.uniform(k2, (hidden_features,), jnp.float32, -lim_e, lim_e)
    w_dec = jax.random.uniform(k3, (input_features, hidden_features),
                               jnp.float32, -lim_d, lim_d)
    b_dec = jax.random.uniform(k4, (input_features,), jnp.float32, -lim_d, lim_d)
    return w_enc, b_enc, w_dec, b_dec


if __name__ == "__main__":
    # Module hyperparameters (same arithmetic as Autoencoder.__init__):
    kernel_size = 8
    channels = 3
    hidden_factor = 0.1
    input_features = kernel_size ** 2 * channels                       # 192
    hidden_features = int(np.round(input_features * hidden_factor))    # 19

    batch = 64
    key = jax.random.PRNGKey(0)
    kx, kp = jax.random.split(key)
    x = jax.random.normal(kx, (batch, input_features), jnp.float32)
    w_enc, b_enc, w_dec, b_dec = init_params(kp, input_features, hidden_features)

    # One-time parameter prep (hoisted out of the per-call path).
    params, dims = prepare_params(w_enc, b_enc, w_dec, b_dec)

    # jit the whole forward so the pad/cast/slice glue fuses around the pallas call.
    fwd = jax.jit(lambda xb: autoencoder_forward(xb, params, dims))

    out = fwd(x)
    out = jax.block_until_ready(out)
    assert out.shape == (batch, input_features)

    # Reference matching the kernel's bf16 operand rounding (f32 accumulation).
    xb = x.astype(jnp.bfloat16).astype(jnp.float32)
    web = w_enc.astype(jnp.bfloat16).astype(jnp.float32)
    wdb = w_dec.astype(jnp.bfloat16).astype(jnp.float32)
    h_ref = jnp.maximum(xb @ web.T + b_enc, 0.0)
    y_ref = h_ref.astype(jnp.bfloat16).astype(jnp.float32) @ wdb.T + b_dec
    np.testing.assert_allclose(np.asarray(out), np.asarray(y_ref),
                               rtol=5e-3, atol=5e-3)

    # Looser sanity check against the full-precision f32 forward pass.
    h_f32 = jnp.maximum(x @ w_enc.T + b_enc, 0.0)
    y_f32 = h_f32 @ w_dec.T + b_dec
    np.testing.assert_allclose(np.asarray(out), np.asarray(y_f32),
                               rtol=6e-2, atol=6e-2)

    print("KERNEL_OK")
</pallas_src>

<mosaic_0001>
module attributes {stable_mosaic.version = 11 : i64} {
  func.func @autoencoder_kernel(%arg0: i32, %arg1: memref<64x256xbf16, #tpu.memory_space<vmem>>, %arg2: memref<256x128xbf16, #tpu.memory_space<vmem>>, %arg3: memref<1x128xf32, #tpu.memory_space<vmem>>, %arg4: memref<128x256xbf16, #tpu.memory_space<vmem>>, %arg5: memref<1x256xf32, #tpu.memory_space<vmem>>, %arg6: memref<64x256xf32, #tpu.memory_space<vmem>>) attributes {dimension_semantics = [#tpu.dimension_semantics<parallel>], iteration_bounds = array<i64: 1>, scalar_prefetch = 0 : i64, scratch_operands = 0 : i64, tpu.core_type = #tpu.core_type<tc>, window_params = [{transform_indices = @transform_0, window_bounds = array<i64: 64, 256>}, {pipeline_mode = #tpu.pipeline_mode<synchronous>, transform_indices = @transform_1, window_bounds = array<i64: 256, 128>}, {pipeline_mode = #tpu.pipeline_mode<synchronous>, transform_indices = @transform_2, window_bounds = array<i64: 1, 128>}, {pipeline_mode = #tpu.pipeline_mode<synchronous>, transform_indices = @transform_3, window_bounds = array<i64: 128, 256>}, {pipeline_mode = #tpu.pipeline_mode<synchronous>, transform_indices = @transform_4, window_bounds = array<i64: 1, 256>}, {transform_indices = @transform_5, window_bounds = array<i64: 64, 256>}]} {
    %c0 = arith.constant 0 : index
    %c0_0 = arith.constant 0 : index
    %0 = vector.load %arg1[%c0, %c0_0] : memref<64x256xbf16, #tpu.memory_space<vmem>>, vector<64x256xbf16>
    %c0_1 = arith.constant 0 : index
    %c0_2 = arith.constant 0 : index
    %1 = vector.load %arg2[%c0_1, %c0_2] : memref<256x128xbf16, #tpu.memory_space<vmem>>, vector<256x128xbf16>
    %cst = arith.constant dense<0.000000e+00> : vector<64x128xf32>
    %2 = tpu.matmul %0, %1, %cst {dimension_numbers = #tpu.dot_dimension_numbers<[1], [0], [0], [1], [0, 0, 1, 1], [], []>} : vector<64x256xbf16>, vector<256x128xbf16>, vector<64x128xf32> -> vector<64x128xf32>
    %c0_3 = arith.constant 0 : index
    %c0_4 = arith.constant 0 : index
    %3 = vector.load %arg3[%c0_3, %c0_4] : memref<1x128xf32, #tpu.memory_space<vmem>>, vector<1x128xf32>
    %4 = vector.broadcast %3 : vector<1x128xf32> to vector<64x128xf32>
    %5 = arith.addf %2, %4 : vector<64x128xf32>
    %cst_5 = arith.constant 0.000000e+00 : f32
    %6 = vector.broadcast %cst_5 : f32 to vector<64x128xf32>
    %7 = arith.maximumf %5, %6 : vector<64x128xf32>
    %8 = arith.truncf %7 : vector<64x128xf32> to vector<64x128xbf16>
    %c0_6 = arith.constant 0 : index
    %c0_7 = arith.constant 0 : index
    %9 = vector.load %arg4[%c0_6, %c0_7] : memref<128x256xbf16, #tpu.memory_space<vmem>>, vector<128x256xbf16>
    %cst_8 = arith.constant dense<0.000000e+00> : vector<64x256xf32>
    %10 = tpu.matmul %8, %9, %cst_8 {dimension_numbers = #tpu.dot_dimension_numbers<[1], [0], [0], [1], [0, 0, 1, 1], [], []>} : vector<64x128xbf16>, vector<128x256xbf16>, vector<64x256xf32> -> vector<64x256xf32>
    %c0_9 = arith.constant 0 : index
    %c0_10 = arith.constant 0 : index
    %11 = vector.load %arg5[%c0_9, %c0_10] : memref<1x256xf32, #tpu.memory_space<vmem>>, vector<1x256xf32>
    %12 = vector.broadcast %11 : vector<1x256xf32> to vector<64x256xf32>
    %13 = arith.addf %10, %12 : vector<64x256xf32>
    %c0_11 = arith.constant 0 : index
    %c0_12 = arith.constant 0 : index
    %14 = vector.load %arg6[%c0_11, %c0_12] : memref<64x256xf32, #tpu.memory_space<vmem>>, vector<64x256xf32>
    tpu.vector_store %arg6[%c0_11, %c0_12], %13 {strides = array<i32>} : memref<64x256xf32, #tpu.memory_space<vmem>>, vector<64x256xf32>,
    return
  }
  func.func @transform_0(%arg0: i32) -> (i32, i32) {
    %c0_i32 = arith.constant 0 : i32
    %c0_i32_0 = arith.constant 0 : i32
    return %arg0, %c0_i32 : i32, i32
  }
  func.func @transform_1(%arg0: i32) -> (i32, i32) {
    %c0_i32 = arith.constant 0 : i32
    %c0_i32_0 = arith.constant 0 : i32
    %c0_i32_1 = arith.constant 0 : i32
    return %c0_i32, %c0_i32_0 : i32, i32
  }
  func.func @transform_2(%arg0: i32) -> (i32, i32) {
    %c0_i32 = arith.constant 0 : i32
    %c0_i32_0 = arith.constant 0 : i32
    %c0_i32_1 = arith.constant 0 : i32
    return %c0_i32, %c0_i32_0 : i32, i32
  }
  func.func @transform_3(%arg0: i32) -> (i32, i32) {
    %c0_i32 = arith.constant 0 : i32
    %c0_i32_0 = arith.constant 0 : i32
    %c0_i32_1 = arith.constant 0 : i32
    return %c0_i32, %c0_i32_0 : i32, i32
  }
  func.func @transform_4(%arg0: i32) -> (i32, i32) {
    %c0_i32 = arith.constant 0 : i32
    %c0_i32_0 = arith.constant 0 : i32
    %c0_i32_1 = arith.constant 0 : i32
    return %c0_i32, %c0_i32_0 : i32, i32
  }
  func.func @transform_5(%arg0: i32) -> (i32, i32) {
    %c0_i32 = arith.constant 0 : i32
    %c0_i32_0 = arith.constant 0 : i32
    return %arg0, %c0_i32 : i32, i32
  }
}

</mosaic_0001>

<bundles_post_ra>
// kernel: _lambda_.1
= control target key start
LH: loop header
LB: loop body
LE: loop exit
PB: predicated region body
PF: predicated region fallthrough
CT: control target
= control target key end

     0   :  { %s929_s0 = inlined_call_operand.vmem [shape: bf16[64,256], index: 0, kind: input, shape index: {}]   ;;  %s930_s1 = inlined_call_operand.vmem [shape: bf16[256,128], index: 1, kind: input, shape index: {}]   ;;  %s931_s2 = inlined_call_operand.vmem [shape: f32[1,128], index: 2, kind: input, shape index: {}]   ;;  %s932_s3 = inlined_call_operand.vmem [shape: bf16[128,256], index: 3, kind: input, shape index: {}]   ;;  %s933_s4 = inlined_call_operand.vmem [shape: f32[1,256], index: 4, kind: input, shape index: {}]   ;;  %s934_s5 = inlined_call_operand.hbm [shape: f32[64,256], index: 5, kind: output, shape index: {}]  }
   0x1   :  { %v640_v0 = vld [vmem:[%s930_s1 + $0x38] sm:$0xff]  ;;  %v639_v2 = vld [vmem:[%s930_s1 + $0x30] sm:$0xff]  ;;  %v638_v4 = vld [vmem:[%s930_s1 + $0x28] sm:$0xff] }
   0x2   :  { %v648_v1 = vld [vmem:[%s930_s1 + $0x78] sm:$0xff]  ;;  %201 = vmatpush.bf16.msra.mxu0 %v640_v0  ;;  %v647_v3 = vld [vmem:[%s930_s1 + $0x70] sm:$0xff]  ;;  %v646_v5 = vld [vmem:[%s930_s1 + $0x68] sm:$0xff] }
   0x3   :  { %230 = vmatpush.bf16.msra.mxu1 %v648_v1 }
   0x6   :  { %202 = vmatpush.bf16.msra.mxu0 %v639_v2 }
   0x7   :  { %231 = vmatpush.bf16.msra.mxu1 %v647_v3 }
   0x8   :  { %10 = vsyncpa [#allocation3], 0  ;;  %v637_v6 = vld [vmem:[%s930_s1 + $0x20] sm:$0xff]  ;;  %v636_v8 = vld [vmem:[%s930_s1 + $0x18] sm:$0xff]  ;;  %s453_s20 = sshll.u32 %s934_s5, 4  ;;  %s696_s21 = smov 256   ;;  %s454_s20 = int_to_ptr.hbm [resolvable:$true] %s453_s20 }
   0x9   :  { %v645_v7 = vld [vmem:[%s930_s1 + $0x60] sm:$0xff]  ;;  %v644_v9 = vld [vmem:[%s930_s1 + $0x58] sm:$0xff]  ;;  %v635_v10 = vld [vmem:[%s930_s1 + $0x10] sm:$0xff]  ;;  %s697_s22 = smov 16  }
   0xa   :  { %203 = vmatpush.bf16.msra.mxu0 %v638_v4  ;;  %v643_v11 = vld [vmem:[%s930_s1 + $0x50] sm:$0xff]  ;;  %v634_v12 = vld [vmem:[%s930_s1 + $0x8] sm:$0xff]  ;;  %v633_v14 = vld [vmem:[%s930_s1] sm:$0xff] }
   0xb   :  { %232 = vmatpush.bf16.msra.mxu1 %v646_v5  ;;  %v642_v13 = vld [vmem:[%s930_s1 + $0x48] sm:$0xff]  ;;  %v641_v15 = vld [vmem:[%s930_s1 + $0x40] sm:$0xff]  ;;  %v475_v22 = vld [vmem:[%s929_s0 + $0x10] sm:$0xf] }
   0xc   :  { %v467_v16 = vld [vmem:[%s929_s0] sm:$0xf]  ;;  %v626_v17 = vld [vmem:[%s929_s0 + $0x4] sm:$0xf0]  ;;  %v625_v18 = vld [vmem:[%s929_s0 + $0x4] sm:$0xf] }
   0xd   :  { %v469_v19 = vld [vmem:[%s929_s0 + $0x8] sm:$0xf0]  ;;  %v468_v20 = vor.u32 %v626_v17, %v467_v16  ;;  %v628_v23 = vld [vmem:[%s929_s0 + $0x14] sm:$0xf0]  ;;  %v627_v24 = vld [vmem:[%s929_s0 + $0x14] sm:$0xf] }
   0xe   :  { %204 = vmatpush.bf16.msra.mxu0 %v637_v6  ;;  %v472_v21 = vor.u32 %v625_v18, %v469_v19  ;;  %v477_v25 = vld [vmem:[%s929_s0 + $0x18] sm:$0xf0]  ;;  %v476_v26 = vor.u32 %v628_v23, %v475_v22  ;;  %v619_v28 = vld [vmem:[%s932_s3 + $0x70] sm:$0xf]  ;;  %v664_v29 = vld [vmem:[%s932_s3 + $0x74] sm:$0xf0] }
   0xf   :  { %233 = vmatpush.bf16.msra.mxu1 %v645_v7  ;;  %v480_v27 = vor.u32 %v627_v24, %v477_v25  ;;  %v663_v30 = vld [vmem:[%s932_s3 + $0x74] sm:$0xf]  ;;  %v620_v31 = vor.u32 %v664_v29, %v619_v28  ;;  %v621_v32 = vld [vmem:[%s932_s3 + $0x78] sm:$0xf0]  ;;  %v611_v33 = vld [vmem:[%s932_s3 + $0x60] sm:$0xf] }
  0x10   :  { %v662_v34 = vld [vmem:[%s932_s3 + $0x64] sm:$0xf0]  ;;  %v624_v35 = vor.u32 %v663_v30, %v621_v32  ;;  %v661_v36 = vld [vmem:[%s932_s3 + $0x64] sm:$0xf]  ;;  %v613_v37 = vld [vmem:[%s932_s3 + $0x68] sm:$0xf0] }
  0x11   :  { %373 = vmatpush.bf16.msra.mxu2 %v620_v31  ;;  %v612_v38 = vor.u32 %v662_v34, %v611_v33  ;;  %v616_v39 = vor.u32 %v661_v36, %v613_v37  ;;  %v603_v40 = vld [vmem:[%s932_s3 + $0x50] sm:$0xf]  ;;  %v660_v41 = vld [vmem:[%s932_s3 + $0x54] sm:$0xf0]  ;;  %v659_v42 = vld [vmem:[%s932_s3 + $0x54] sm:$0xf] }
  0x12   :  { %205 = vmatpush.bf16.msra.mxu0 %v636_v8  ;;  %402 = vmatpush.bf16.msra.mxu3 %v624_v35  ;;  %v605_v43 = vld [vmem:[%s932_s3 + $0x58] sm:$0xf0]  ;;  %v604_v44 = vor.u32 %v660_v41, %v603_v40  ;;  %v483_v45 = vld [vmem:[%s929_s0 + $0x20] sm:$0xf]  ;;  %v658_v48 = vld [vmem:[%s932_s3 + $0x44] sm:$0xf0] }
  0x13   :  { %234 = vmatpush.bf16.msra.mxu1 %v644_v9  ;;  %v608_v46 = vor.u32 %v659_v42, %v605_v43  ;;  %v595_v47 = vld [vmem:[%s932_s3 + $0x40] sm:$0xf]  ;;  %v630_v49 = vld [vmem:[%s929_s0 + $0x24] sm:$0xf0]  ;;  %v629_v50 = vld [vmem:[%s929_s0 + $0x24] sm:$0xf] }
  0x14   :  { %v485_v51 = vld [vmem:[%s929_s0 + $0x28] sm:$0xf0]  ;;  %v657_v52 = vld [vmem:[%s932_s3 + $0x44] sm:$0xf]  ;;  %v596_v54 = vor.u32 %v658_v48, %v595_v47  ;;  %v484_v55 = vor.u32 %v630_v49, %v483_v45  ;;  %v491_v58 = vld [vmem:[%s929_s0 + $0x30] sm:$0xf] }
  0x15   :  { %374 = vmatpush.bf16.msra.mxu2 %v612_v38  ;;  %v597_v53 = vld [vmem:[%s932_s3 + $0x48] sm:$0xf0]  ;;  %v488_v56 = vor.u32 %v629_v50, %v485_v51  ;;  %v632_v59 = vld [vmem:[%s929_s0 + $0x34] sm:$0xf0]  ;;  %v631_v60 = vld [vmem:[%s929_s0 + $0x34] sm:$0xf] }
  0x16   :  { %206 = vmatpush.bf16.msra.mxu0 %v635_v10  ;;  %403 = vmatpush.bf16.msra.mxu3 %v616_v39  ;;  %v600_v57 = vor.u32 %v657_v52, %v597_v53  ;;  %v493_v61 = vld [vmem:[%s929_s0 + $0x38] sm:$0xf0]  ;;  %v492_v62 = vor.u32 %v632_v59, %v491_v58  ;;  %v587_v0 = vld [vmem:[%s932_s3 + $0x30] sm:$0xf]  ;;  %v656_v1 = vld [vmem:[%s932_s3 + $0x34] sm:$0xf0] }
  0x17   :  { %235 = vmatpush.bf16.msra.mxu1 %v643_v11  ;;  %v496_v63 = vor.u32 %v631_v60, %v493_v61  ;;  %v655_v2 = vld [vmem:[%s932_s3 + $0x34] sm:$0xf]  ;;  %v588_v3 = vor.u32 %v656_v1, %v587_v0  ;;  %v589_v4 = vld [vmem:[%s932_s3 + $0x38] sm:$0xf0]  ;;  %v579_v6 = vld [vmem:[%s932_s3 + $0x20] sm:$0xf] }
  0x18   :  { %v592_v5 = vor.u32 %v655_v2, %v589_v4  ;;  %v654_v7 = vld [vmem:[%s932_s3 + $0x24] sm:$0xf0]  ;;  %v653_v8 = vld [vmem:[%s932_s3 + $0x24] sm:$0xf]  ;;  %v581_v10 = vld [vmem:[%s932_s3 + $0x28] sm:$0xf0] }
  0x19   :  { %375 = vmatpush.bf16.msra.mxu2 %v604_v44  ;;  %v580_v9 = vor.u32 %v654_v7, %v579_v6  ;;  %v584_v11 = vor.u32 %v653_v8, %v581_v10  ;;  %v573_v16 = vld [vmem:[%s932_s3 + $0x18] sm:$0xf0]  ;;  %v563_v18 = vld [vmem:[%s932_s3] sm:$0xf]  ;;  %v650_v19 = vld [vmem:[%s932_s3 + $0x4] sm:$0xf0] }
  0x1a   :  { %207 = vmatpush.bf16.msra.mxu0 %v634_v12  ;;  %404 = vmatpush.bf16.msra.mxu3 %v608_v46  ;;  %v571_v12 = vld [vmem:[%s932_s3 + $0x10] sm:$0xf]  ;;  %v565_v22 = vld [vmem:[%s932_s3 + $0x8] sm:$0xf0] }
  0x1b   :  { %236 = vmatpush.bf16.msra.mxu1 %v642_v13  ;;  %v652_v13 = vld [vmem:[%s932_s3 + $0x14] sm:$0xf0] }
  0x1d   :  { %376 = vmatpush.bf16.msra.mxu2 %v596_v54 }
  0x1e   :  { %208 = vmatpush.bf16.msra.mxu0 %v633_v14  ;;  %405 = vmatpush.bf16.msra.mxu3 %v600_v57  ;;  %v651_v14 = vld [vmem:[%s932_s3 + $0x14] sm:$0xf] }
  0x1f   :  { %237 = vmatpush.bf16.msra.mxu1 %v641_v15  ;;  %v572_v15 = vor.u32 %v652_v13, %v571_v12  ;;  %v576_v17 = vor.u32 %v651_v14, %v573_v16 }
  0x21   :  { %209 = vmatmul.bf16.vlgmr.msra.gmra.mxu0 %v468_v20  ;;  %377 = vmatpush.bf16.msra.mxu2 %v588_v3  ;;  %v649_v20 = vld [vmem:[%s932_s3 + $0x4] sm:$0xf] }
  0x22   :  { %238 = vmatmul.bf16.vlgmr.msra.gmra.mxu1 %v472_v21  ;;  %406 = vmatpush.bf16.msra.mxu3 %v592_v5  ;;  %v564_v21 = vor.u32 %v650_v19, %v563_v18  ;;  %v568_v23 = vor.u32 %v649_v20, %v565_v22  ;;  %v287_v5 = vld [vmem:[%s933_s4] sm:$0x3]  ;;  %s695_s4 = smov [#allocation2]  }
  0x23   :  { %v289_v6 = vperm.slane %v287_v5, 0  ;;  %v290_v7 = vperm.slane %v287_v5, 1  ;;  %s451_s18 = sshll.u32 %s695_s4, 4  ;;  %s452_s18 = int_to_ptr.vmem [resolvable:$true] %s451_s18 }
  0x25   :  { %378 = vmatpush.bf16.msra.mxu2 %v580_v9 }
  0x26   :  { %407 = vmatpush.bf16.msra.mxu3 %v584_v11 }
  0x29   :  { %379 = vmatpush.bf16.msra.mxu2 %v572_v15 }
  0x2a   :  { %408 = vmatpush.bf16.msra.mxu3 %v576_v17 }
  0x2d   :  { %380 = vmatpush.bf16.msra.mxu2 %v564_v21 }
  0x2e   :  { %409 = vmatpush.bf16.msra.mxu3 %v568_v23 }
  0x31   :  { %214 = vmatmul.bf16.gmra.mxu0 %v476_v26  ;;  %v668_v26 = vld [vmem:[%s931_s2] ss:$0 sm:$0xff] }
  0x32   :  { %243 = vmatmul.bf16.gmra.mxu1 %v480_v27 }
  0x41   :  { %219 = vmatmul.bf16.gmra.mxu0 %v484_v55 }
  0x42   :  { %248 = vmatmul.bf16.gmra.mxu1 %v488_v56 }
  0x51   :  { %224 = vmatmul.bf16.gmra.mxu0 %v492_v62 }
  0x52   :  { %253 = vmatmul.bf16.gmra.mxu1 %v496_v63 }
  0x9e   :  { %v210_v24 = vpop.f32.mrf.mxu0 }
  0x9f   :  { %v239_v25 = vpop.f32.mrf.mxu1  ;;  %v211_v27 = vadd.f32 %v668_v26, %v210_v24 }
  0xa1   :  { %v240_v30 = vadd.f32 %v239_v25, %v211_v27 }
  0xa3   :  { %v259_v33 = vmax.f32 %v240_v30, 0.0 }
  0xa6   :  { %v212_v28 = vpop.f32.mrf.mxu0 }
  0xa7   :  { %v241_v29 = vpop.f32.mrf.mxu1  ;;  %v213_v31 = vadd.f32 %v668_v26, %v212_v28 }
  0xa9   :  { %v242_v32 = vadd.f32 %v241_v29, %v213_v31 }
  0xab   :  { %v260_v34 = vmax.f32 %v242_v32, 0.0 }
  0xad   :  { %v267_v35 = vpack.c.bf16 %v260_v34, %v259_v33 }
  0xae   :  { %v215_v36 = vpop.f32.mrf.mxu0 }
  0xaf   :  { %v244_v37 = vpop.f32.mrf.mxu1  ;;  %381 = vmatmul.bf16.vlgmr.msra.gmra.mxu2 %v267_v35  ;;  %410 = vmatmul.bf16.vlgmr.msra.gmra.mxu3 %v267_v35  ;;  %v216_v38 = vadd.f32 %v668_v26, %v215_v36 }
  0xb1   :  { %v245_v41 = vadd.f32 %v244_v37, %v216_v38 }
  0xb3   :  { %v261_v44 = vmax.f32 %v245_v41, 0.0 }
  0xb6   :  { %v217_v39 = vpop.f32.mrf.mxu0 }
  0xb7   :  { %v246_v40 = vpop.f32.mrf.mxu1  ;;  %v218_v42 = vadd.f32 %v668_v26, %v217_v39 }
  0xb9   :  { %v247_v43 = vadd.f32 %v246_v40, %v218_v42 }
  0xbb   :  { %v262_v45 = vmax.f32 %v247_v43, 0.0 }
  0xbd   :  { %v268_v46 = vpack.c.bf16 %v262_v45, %v261_v44 }
  0xbe   :  { %v220_v47 = vpop.f32.mrf.mxu0 }
  0xbf   :  { %v249_v48 = vpop.f32.mrf.mxu1  ;;  %386 = vmatmul.bf16.gmra.mxu2 %v268_v46  ;;  %415 = vmatmul.bf16.gmra.mxu3 %v268_v46  ;;  %v221_v49 = vadd.f32 %v668_v26, %v220_v47 }
  0xc1   :  { %v250_v52 = vadd.f32 %v249_v48, %v221_v49 }
  0xc3   :  { %v263_v55 = vmax.f32 %v250_v52, 0.0 }
  0xc6   :  { %v222_v50 = vpop.f32.mrf.mxu0 }
  0xc7   :  { %v251_v51 = vpop.f32.mrf.mxu1  ;;  %v223_v53 = vadd.f32 %v668_v26, %v222_v50 }
  0xc9   :  { %v252_v54 = vadd.f32 %v251_v51, %v223_v53 }
  0xcb   :  { %v264_v56 = vmax.f32 %v252_v54, 0.0 }
  0xcd   :  { %v269_v57 = vpack.c.bf16 %v264_v56, %v263_v55 }
  0xce   :  { %v225_v58 = vpop.f32.mrf.mxu0 }
  0xcf   :  { %v254_v59 = vpop.f32.mrf.mxu1  ;;  %391 = vmatmul.bf16.gmra.mxu2 %v269_v57  ;;  %420 = vmatmul.bf16.gmra.mxu3 %v269_v57  ;;  %v226_v60 = vadd.f32 %v668_v26, %v225_v58 }
  0xd1   :  { %v255_v62 = vadd.f32 %v254_v59, %v226_v60 }
  0xd3   :  { %v265_v2 = vmax.f32 %v255_v62, 0.0 }
  0xd6   :  { %v227_v61 = vpop.f32.mrf.mxu0 }
  0xd7   :  { %v228_v63 = vadd.f32 %v668_v26, %v227_v61  ;;  %v256_v0 = vpop.f32.mrf.mxu1 }
  0xd9   :  { %v257_v1 = vadd.f32 %v256_v0, %v228_v63 }
  0xdb   :  { %v266_v3 = vmax.f32 %v257_v1, 0.0 }
  0xdd   :  { %v270_v4 = vpack.c.bf16 %v266_v3, %v265_v2 }
  0xdf   :  { %396 = vmatmul.bf16.gmra.mxu2 %v270_v4  ;;  %425 = vmatmul.bf16.gmra.mxu3 %v270_v4 }
 0x132   :  { %v382_v8 = vpop.f32.mrf.mxu2  ;;  %v411_v9 = vpop.f32.mrf.mxu3 }
 0x133   :  { %v383_v10 = vadd.f32 %v382_v8, %v289_v6  ;;  %v412_v11 = vadd.f32 %v411_v9, %v290_v7 }
 0x135   :  { %431 = vst [vmem:[#allocation2] sm:$0xff] %v383_v10 }
 0x136   :  { %432 = vst [vmem:[#allocation2 + $0x8] sm:$0xff] %v412_v11 }
 0x13a   :  { %v384_v12 = vpop.f32.mrf.mxu2  ;;  %v413_v13 = vpop.f32.mrf.mxu3 }
 0x13b   :  { %v385_v14 = vadd.f32 %v384_v12, %v289_v6  ;;  %v414_v15 = vadd.f32 %v413_v13, %v290_v7 }
 0x13d   :  { %433 = vst [vmem:[#allocation2 + $0x10] sm:$0xff] %v385_v14 }
 0x13e   :  { %434 = vst [vmem:[#allocation2 + $0x18] sm:$0xff] %v414_v15 }
 0x142   :  { %v387_v16 = vpop.f32.mrf.mxu2  ;;  %v416_v17 = vpop.f32.mrf.mxu3 }
 0x143   :  { %v388_v18 = vadd.f32 %v387_v16, %v289_v6  ;;  %v417_v19 = vadd.f32 %v416_v17, %v290_v7 }
 0x145   :  { %435 = vst [vmem:[#allocation2 + $0x20] sm:$0xff] %v388_v18 }
 0x146   :  { %436 = vst [vmem:[#allocation2 + $0x28] sm:$0xff] %v417_v19 }
 0x14a   :  { %v389_v20 = vpop.f32.mrf.mxu2  ;;  %v418_v21 = vpop.f32.mrf.mxu3 }
 0x14b   :  { %v390_v22 = vadd.f32 %v389_v20, %v289_v6  ;;  %v419_v23 = vadd.f32 %v418_v21, %v290_v7 }
 0x14d   :  { %437 = vst [vmem:[#allocation2 + $0x30] sm:$0xff] %v390_v22 }
 0x14e   :  { %438 = vst [vmem:[#allocation2 + $0x38] sm:$0xff] %v419_v23 }
 0x152   :  { %v392_v24 = vpop.f32.mrf.mxu2  ;;  %v421_v25 = vpop.f32.mrf.mxu3 }
 0x153   :  { %v393_v26 = vadd.f32 %v392_v24, %v289_v6  ;;  %v422_v27 = vadd.f32 %v421_v25, %v290_v7 }
 0x155   :  { %439 = vst [vmem:[#allocation2 + $0x40] sm:$0xff] %v393_v26 }
 0x156   :  { %440 = vst [vmem:[#allocation2 + $0x48] sm:$0xff] %v422_v27 }
 0x15a   :  { %v394_v28 = vpop.f32.mrf.mxu2  ;;  %v423_v29 = vpop.f32.mrf.mxu3 }
 0x15b   :  { %v395_v30 = vadd.f32 %v394_v28, %v289_v6  ;;  %v424_v31 = vadd.f32 %v423_v29, %v290_v7 }
 0x15d   :  { %441 = vst [vmem:[#allocation2 + $0x50] sm:$0xff] %v395_v30 }
 0x15e   :  { %442 = vst [vmem:[#allocation2 + $0x58] sm:$0xff] %v424_v31 }
 0x162   :  { %v397_v32 = vpop.f32.mrf.mxu2  ;;  %v426_v33 = vpop.f32.mrf.mxu3 }
 0x163   :  { %v398_v34 = vadd.f32 %v397_v32, %v289_v6  ;;  %v427_v35 = vadd.f32 %v426_v33, %v290_v7 }
 0x165   :  { %443 = vst [vmem:[#allocation2 + $0x60] sm:$0xff] %v398_v34 }
 0x166   :  { %444 = vst [vmem:[#allocation2 + $0x68] sm:$0xff] %v427_v35 }
 0x16a   :  { %v399_v36 = vpop.f32.mrf.mxu2  ;;  %v428_v37 = vpop.f32.mrf.mxu3 }
 0x16b   :  { %v400_v38 = vadd.f32 %v399_v36, %v289_v6  ;;  %v429_v39 = vadd.f32 %v428_v37, %v290_v7 }
 0x16d   :  { %445 = vst [vmem:[#allocation2 + $0x70] sm:$0xff] %v400_v38 }
 0x16e   :  { %446 = vst [vmem:[#allocation2 + $0x78] sm:$0xff] %v429_v39 }
 0x16f   :  { %459 = dma.vmem_to_hbm [thread:$0]  %s452_s18, 2048, %s454_s20, [#allocation3], %s696_s21, %s696_s21, %s697_s22  }
 0x170   :  { %693 = dma.done.wait [#allocation3], 2048  }
 0x171   :  { %694 = vsyncadd [#allocation3], 4294965248 }
 0x172   :  { %464 = vsyncpa [#allocation3], 1 }

</bundles_post_ra>
